<compile_context>
chip_gen: v7x
topology: tpu7x:2x2x1
jax: 0.10.0
libtpu: 0.0.40
codegen_flags: <defaults>
</compile_context>

<pallas_src>
import math
import functools

import jax
import jax.numpy as jnp
import numpy as np
from jax import lax
from jax.experimental import pallas as pl
from jax.experimental.pallas import tpu as pltpu


# Generation-aware tile caps (safe for v7x's 64 MiB VMEM; also best region on v5e/v6e).
_TQ_CAP = 512
_TK_CAP = 1024


def _mea_kernel(q_ref, k_ref, v_ref, o_ref, qs_sc, m_sc, l_sc, acc_sc, *, scale):
    """Online-softmax attention; grid axis 2 (kv) is the serial reduction axis."""
    kv = pl.program_id(2)

    @pl.when(kv == 0)
    def _init():
        # q block is constant across the kv axis -> scale it once per (head, q-tile),
        # in its native dtype so the MXU sees bf16 operands when inputs are bf16.
        qs_sc[...] = q_ref[0] * scale
        m_sc[...] = jnp.full_like(m_sc, -jnp.inf)
        l_sc[...] = jnp.zeros_like(l_sc)
        acc_sc[...] = jnp.zeros_like(acc_sc)

    # QK^T without materializing a transpose; native-dtype operands, f32 accumulation.
    s = lax.dot_general(
        qs_sc[...], k_ref[0],
        dimension_numbers=(((1,), (1,)), ((), ())),
        preferred_element_type=jnp.float32)                    # (tq, tk) f32

    m_prev = m_sc[...]
    m_new = jnp.maximum(m_prev, s.max(axis=-1, keepdims=True))  # (tq, 1)
    alpha = jnp.exp(m_prev - m_new)
    p = jnp.exp(s - m_new)                                      # (tq, tk) f32

    l_sc[...] = alpha * l_sc[...] + p.sum(axis=-1, keepdims=True)
    acc_sc[...] = alpha * acc_sc[...] + jnp.dot(
        p.astype(v_ref.dtype), v_ref[0], preferred_element_type=jnp.float32)
    m_sc[...] = m_new

    @pl.when(kv == pl.num_programs(2) - 1)
    def _finalize():
        inv_l = pl.reciprocal(l_sc[...], approx=True)   # EUP; multiply co-issues on VPU
        o_ref[0] = (acc_sc[...] * inv_l).astype(o_ref.dtype)


def _pick_tile(total, requested, cap):
    """Largest tile <= min(requested, cap, total) that divides `total` and is a
    multiple of 8 (sublane) or the full extent."""
    t = max(1, min(requested, cap, total))
    for cand in range(t, 0, -1):
        if total % cand == 0 and (cand % 8 == 0 or cand == total):
            return cand
    return total


def faster_multi_head_attention(query, key, value, *, query_chunk_size=1024,
                                key_chunk_size=4096):
    """query/key/value in PyTorch layout (S, H, D); returns (num_q, H, d_v)."""
    num_q, num_heads, d_qk = query.shape
    num_kv, _, d_v = value.shape

    # Respect the module's chunk sizes but cap the actual kernel tiles so the
    # (tq, tk) f32 temporaries + double-buffered tiles stay well inside scoped VMEM.
    tq = _pick_tile(num_q, query_chunk_size, _TQ_CAP)
    tk = _pick_tile(num_kv, key_chunk_size, _TK_CAP)

    scale = 1.0 / math.sqrt(float(d_qk))

    # (H, S, D) layout inside the kernel.
    # TODO(synk): these transposes are full HBM round trips outside the kernel; callers
    # in a bandwidth-bound regime should provide (H, S, D) directly / fuse upstream.
    q_hsd = jnp.transpose(query, (1, 0, 2))
    k_hsd = jnp.transpose(key, (1, 0, 2))
    v_hsd = jnp.transpose(value, (1, 0, 2))

    grid = (num_heads, num_q // tq, num_kv // tk)

    out_hsd = pl.pallas_call(
        functools.partial(_mea_kernel, scale=scale),
        out_shape=jax.ShapeDtypeStruct((num_heads, num_q, d_v), query.dtype),
        grid_spec=pltpu.PrefetchScalarGridSpec(
            num_scalar_prefetch=0,
            grid=grid,
            in_specs=[
                pl.BlockSpec((1, tq, d_qk), lambda h, i, j: (h, i, 0)),
                pl.BlockSpec((1, tk, d_qk), lambda h, i, j: (h, j, 0)),
                pl.BlockSpec((1, tk, d_v), lambda h, i, j: (h, j, 0)),
            ],
            out_specs=pl.BlockSpec((1, tq, d_v), lambda h, i, j: (h, i, 0)),
            scratch_shapes=[
                pltpu.VMEM((tq, d_qk), q_hsd.dtype),  # scaled q (resident across kv)
                pltpu.VMEM((tq, 1), jnp.float32),     # running max
                pltpu.VMEM((tq, 1), jnp.float32),     # running denom
                pltpu.VMEM((tq, d_v), jnp.float32),   # running numerator
            ],
        ),
        compiler_params=pltpu.CompilerParams(
            dimension_semantics=("parallel", "parallel", "arbitrary"),
            vmem_limit_bytes=48 * 1024 * 1024),
    )(q_hsd, k_hsd, v_hsd)

    # back to PyTorch layout (num_q, num_heads, d_v)
    return jnp.transpose(out_hsd, (1, 0, 2))


def _reference_attention(query, key, value):
    d_qk = query.shape[-1]
    q = query.astype(jnp.float32) / jnp.sqrt(jnp.float32(d_qk))
    s = jnp.einsum("qhd,khd->qhk", q, key.astype(jnp.float32))
    p = jax.nn.softmax(s, axis=-1)
    return jnp.einsum("qhk,khf->qhf", p, value.astype(jnp.float32))


if __name__ == "__main__":
    # Small shapes consistent with the module's (seq, heads, features) convention.
    num_q, num_kv, num_heads, d_qk, d_v = 32, 64, 2, 32, 32

    key0 = jax.random.PRNGKey(0)
    kq, kk, kv = jax.random.split(key0, 3)
    q32 = jax.random.normal(kq, (num_q, num_heads, d_qk), dtype=jnp.float32)
    k32 = jax.random.normal(kk, (num_kv, num_heads, d_qk), dtype=jnp.float32)
    v32 = jax.random.normal(kv, (num_kv, num_heads, d_v), dtype=jnp.float32)

    ref = jax.block_until_ready(_reference_attention(q32, k32, v32))

    # f32 inputs; small chunk sizes so the grid actually iterates over q/kv chunks.
    out_f32 = jax.block_until_ready(
        faster_multi_head_attention(q32, k32, v32,
                                    query_chunk_size=16, key_chunk_size=32))
    np.testing.assert_allclose(np.asarray(out_f32), np.asarray(ref),
                               rtol=2e-2, atol=2e-2)

    # bf16 inputs: native MXU dtype path (operands stay bf16, accumulators f32).
    out_bf16 = jax.block_until_ready(
        faster_multi_head_attention(q32.astype(jnp.bfloat16),
                                    k32.astype(jnp.bfloat16),
                                    v32.astype(jnp.bfloat16),
                                    query_chunk_size=16, key_chunk_size=32))
    np.testing.assert_allclose(np.asarray(out_bf16, dtype=np.float32),
                               np.asarray(ref), rtol=5e-2, atol=5e-2)

    print("KERNEL_OK")
</pallas_src>

<mosaic_0001>
module attributes {stable_mosaic.version = 11 : i64} {
  func.func @_mea_kernel(%arg0: i32, %arg1: i32, %arg2: i32, %arg3: memref<1x16x32xf32, #tpu.memory_space<vmem>>, %arg4: memref<1x32x32xf32, #tpu.memory_space<vmem>>, %arg5: memref<1x32x32xf32, #tpu.memory_space<vmem>>, %arg6: memref<1x16x32xf32, #tpu.memory_space<vmem>>, %arg7: memref<16x32xf32, #tpu.memory_space<vmem>>, %arg8: memref<16x1xf32, #tpu.memory_space<vmem>>, %arg9: memref<16x1xf32, #tpu.memory_space<vmem>>, %arg10: memref<16x32xf32, #tpu.memory_space<vmem>>) attributes {dimension_semantics = [#tpu.dimension_semantics<parallel>, #tpu.dimension_semantics<parallel>, #tpu.dimension_semantics<arbitrary>], iteration_bounds = array<i64: 2, 2, 2>, scalar_prefetch = 0 : i64, scratch_operands = 4 : i64, tpu.core_type = #tpu.core_type<tc>, window_params = [{transform_indices = @transform_0, window_bounds = array<i64: 1, 16, 32>}, {transform_indices = @transform_1, window_bounds = array<i64: 1, 32, 32>}, {transform_indices = @transform_2, window_bounds = array<i64: 1, 32, 32>}, {transform_indices = @transform_3, window_bounds = array<i64: 1, 16, 32>}]} {
    %c0_i32 = arith.constant 0 : i32
    %0 = arith.cmpi eq, %arg2, %c0_i32 : i32
    %1 = arith.extui %0 : i1 to i32
    %c0_i32_0 = arith.constant 0 : i32
    %2 = arith.cmpi ne, %1, %c0_i32_0 : i32
    scf.if %2 {
      %c0_24 = arith.constant 0 : index
      %c0_25 = arith.constant 0 : index
      %c0_26 = arith.constant 0 : index
      %34 = vector.load %arg3[%c0_24, %c0_25, %c0_26] : memref<1x16x32xf32, #tpu.memory_space<vmem>>, vector<1x16x32xf32>
      %35 = vector.shape_cast %34 : vector<1x16x32xf32> to vector<16x32xf32>
      %cst_27 = arith.constant 0.176776692 : f32
      %36 = vector.broadcast %cst_27 : f32 to vector<16x32xf32>
      %37 = arith.mulf %35, %36 : vector<16x32xf32>
      %c0_28 = arith.constant 0 : index
      %c0_29 = arith.constant 0 : index
      %38 = vector.load %arg7[%c0_28, %c0_29] : memref<16x32xf32, #tpu.memory_space<vmem>>, vector<16x32xf32>
      tpu.vector_store %arg7[%c0_28, %c0_29], %37 {strides = array<i32>} : memref<16x32xf32, #tpu.memory_space<vmem>>, vector<16x32xf32>,
      %cst_30 = arith.constant 0xFF800000 : f32
      %39 = vector.broadcast %cst_30 : f32 to vector<16x1xf32>
      %c0_31 = arith.constant 0 : index
      %c0_32 = arith.constant 0 : index
      %40 = vector.load %arg8[%c0_31, %c0_32] : memref<16x1xf32, #tpu.memory_space<vmem>>, vector<16x1xf32>
      tpu.vector_store %arg8[%c0_31, %c0_32], %39 {strides = array<i32>} : memref<16x1xf32, #tpu.memory_space<vmem>>, vector<16x1xf32>,
      %cst_33 = arith.constant 0.000000e+00 : f32
      %41 = vector.broadcast %cst_33 : f32 to vector<16x1xf32>
      %c0_34 = arith.constant 0 : index
      %c0_35 = arith.constant 0 : index
      %42 = vector.load %arg9[%c0_34, %c0_35] : memref<16x1xf32, #tpu.memory_space<vmem>>, vector<16x1xf32>
      tpu.vector_store %arg9[%c0_34, %c0_35], %41 {strides = array<i32>} : memref<16x1xf32, #tpu.memory_space<vmem>>, vector<16x1xf32>,
      %cst_36 = arith.constant 0.000000e+00 : f32
      %43 = vector.broadcast %cst_36 : f32 to vector<16x32xf32>
      %c0_37 = arith.constant 0 : index
      %c0_38 = arith.constant 0 : index
      %44 = vector.load %arg10[%c0_37, %c0_38] : memref<16x32xf32, #tpu.memory_space<vmem>>, vector<16x32xf32>
      tpu.vector_store %arg10[%c0_37, %c0_38], %43 {strides = array<i32>} : memref<16x32xf32, #tpu.memory_space<vmem>>, vector<16x32xf32>,
    } else {
    }
    %c0 = arith.constant 0 : index
    %c0_1 = arith.constant 0 : index
    %3 = vector.load %arg7[%c0, %c0_1] : memref<16x32xf32, #tpu.memory_space<vmem>>, vector<16x32xf32>
    %c0_2 = arith.constant 0 : index
    %c0_3 = arith.constant 0 : index
    %c0_4 = arith.constant 0 : index
    %4 = vector.load %arg4[%c0_2, %c0_3, %c0_4] : memref<1x32x32xf32, #tpu.memory_space<vmem>>, vector<1x32x32xf32>
    %5 = vector.shape_cast %4 : vector<1x32x32xf32> to vector<32x32xf32>
    %cst = arith.constant dense<0.000000e+00> : vector<16x32xf32>
    %6 = tpu.matmul %3, %5, %cst {dimension_numbers = #tpu.dot_dimension_numbers<[1], [1], [0], [0], [0, 0, 1, 0], [], []>} : vector<16x32xf32>, vector<32x32xf32>, vector<16x32xf32> -> vector<16x32xf32>
    %c0_5 = arith.constant 0 : index
    %c0_6 = arith.constant 0 : index
    %7 = vector.load %arg8[%c0_5, %c0_6] : memref<16x1xf32, #tpu.memory_space<vmem>>, vector<16x1xf32>
    %cst_7 = arith.constant dense<0xFF800000> : vector<16xf32>
    %8 = vector.multi_reduction <maximumf>, %6, %cst_7 [1] : vector<16x32xf32> to vector<16xf32>
    %9 = vector.shape_cast %8 : vector<16xf32> to vector<16x1xf32>
    %10 = arith.maximumf %7, %9 : vector<16x1xf32>
    %11 = arith.subf %7, %10 : vector<16x1xf32>
    %12 = math.exp %11 : vector<16x1xf32>
    %13 = vector.broadcast %10 : vector<16x1xf32> to vector<16x32xf32>
    %14 = arith.subf %6, %13 : vector<16x32xf32>
    %15 = math.exp %14 : vector<16x32xf32>
    %c0_8 = arith.constant 0 : index
    %c0_9 = arith.constant 0 : index
    %16 = vector.load %arg9[%c0_8, %c0_9] : memref<16x1xf32, #tpu.memory_space<vmem>>, vector<16x1xf32>
    %17 = arith.mulf %12, %16 : vector<16x1xf32>
    %cst_10 = arith.constant dense<0.000000e+00> : vector<16xf32>
    %18 = vector.multi_reduction <add>, %15, %cst_10 [1] : vector<16x32xf32> to vector<16xf32>
    %19 = vector.shape_cast %18 : vector<16xf32> to vector<16x1xf32>
    %20 = arith.addf %17, %19 : vector<16x1xf32>
    %c0_11 = arith.constant 0 : index
    %c0_12 = arith.constant 0 : index
    %21 = vector.load %arg9[%c0_11, %c0_12] : memref<16x1xf32, #tpu.memory_space<vmem>>, vector<16x1xf32>
    tpu.vector_store %arg9[%c0_11, %c0_12], %20 {strides = array<i32>} : memref<16x1xf32, #tpu.memory_space<vmem>>, vector<16x1xf32>,
    %c0_13 = arith.constant 0 : index
    %c0_14 = arith.constant 0 : index
    %22 = vector.load %arg10[%c0_13, %c0_14] : memref<16x32xf32, #tpu.memory_space<vmem>>, vector<16x32xf32>
    %23 = vector.broadcast %12 : vector<16x1xf32> to vector<16x32xf32>
    %24 = arith.mulf %23, %22 : vector<16x32xf32>
    %c0_15 = arith.constant 0 : index
    %c0_16 = arith.constant 0 : index
    %c0_17 = arith.constant 0 : index
    %25 = vector.load %arg5[%c0_15, %c0_16, %c0_17] : memref<1x32x32xf32, #tpu.memory_space<vmem>>, vector<1x32x32xf32>
    %26 = vector.shape_cast %25 : vector<1x32x32xf32> to vector<32x32xf32>
    %cst_18 = arith.constant dense<0.000000e+00> : vector<16x32xf32>
    %27 = tpu.matmul %15, %26, %cst_18 {dimension_numbers = #tpu.dot_dimension_numbers<[1], [0], [0], [1], [0, 0, 1, 1], [], []>} : vector<16x32xf32>, vector<32x32xf32>, vector<16x32xf32> -> vector<16x32xf32>
    %28 = arith.addf %24, %27 : vector<16x32xf32>
    %c0_19 = arith.constant 0 : index
    %c0_20 = arith.constant 0 : index
    %29 = vector.load %arg10[%c0_19, %c0_20] : memref<16x32xf32, #tpu.memory_space<vmem>>, vector<16x32xf32>
    tpu.vector_store %arg10[%c0_19, %c0_20], %28 {strides = array<i32>} : memref<16x32xf32, #tpu.memory_space<vmem>>, vector<16x32xf32>,
    %c0_21 = arith.constant 0 : index
    %c0_22 = arith.constant 0 : index
    %30 = vector.load %arg8[%c0_21, %c0_22] : memref<16x1xf32, #tpu.memory_space<vmem>>, vector<16x1xf32>
    tpu.vector_store %arg8[%c0_21, %c0_22], %10 {strides = array<i32>} : memref<16x1xf32, #tpu.memory_space<vmem>>, vector<16x1xf32>,
    %c1_i32 = arith.constant 1 : i32
    %31 = arith.cmpi eq, %arg2, %c1_i32 : i32
    %32 = arith.extui %31 : i1 to i32
    %c0_i32_23 = arith.constant 0 : i32
    %33 = arith.cmpi ne, %32, %c0_i32_23 : i32
    scf.if %33 {
      %c0_24 = arith.constant 0 : index
      %c0_25 = arith.constant 0 : index
      %34 = vector.load %arg9[%c0_24, %c0_25] : memref<16x1xf32, #tpu.memory_space<vmem>>, vector<16x1xf32>
      %35 = tpu.reciprocal %34 {approx = true} : vector<16x1xf32> -> vector<16x1xf32>
      %c0_26 = arith.constant 0 : index
      %c0_27 = arith.constant 0 : index
      %36 = vector.load %arg10[%c0_26, %c0_27] : memref<16x32xf32, #tpu.memory_space<vmem>>, vector<16x32xf32>
      %37 = vector.broadcast %35 : vector<16x1xf32> to vector<16x32xf32>
      %38 = arith.mulf %36, %37 : vector<16x32xf32>
      %c0_28 = arith.constant 0 : index
      %c0_29 = arith.constant 0 : index
      %c0_30 = arith.constant 0 : index
      %39 = vector.load %arg6[%c0_28, %c0_29, %c0_30] : memref<1x16x32xf32, #tpu.memory_space<vmem>>, vector<1x16x32xf32>
      %40 = vector.shape_cast %39 : vector<1x16x32xf32> to vector<16x32xf32>
      %41 = vector.shape_cast %38 : vector<16x32xf32> to vector<1x16x32xf32>
      tpu.vector_store %arg6[%c0_28, %c0_29, %c0_30], %41 {strides = array<i32>} : memref<1x16x32xf32, #tpu.memory_space<vmem>>, vector<1x16x32xf32>,
    } else {
    }
    return
  }
  func.func @transform_0(%arg0: i32, %arg1: i32, %arg2: i32) -> (i32, i32, i32) {
    %c0_i32 = arith.constant 0 : i32
    %c0_i32_0 = arith.constant 0 : i32
    return %arg0, %arg1, %c0_i32 : i32, i32, i32
  }
  func.func @transform_1(%arg0: i32, %arg1: i32, %arg2: i32) -> (i32, i32, i32) {
    %c0_i32 = arith.constant 0 : i32
    %c0_i32_0 = arith.constant 0 : i32
    return %arg0, %arg2, %c0_i32 : i32, i32, i32
  }
  func.func @transform_2(%arg0: i32, %arg1: i32, %arg2: i32) -> (i32, i32, i32) {
    %c0_i32 = arith.constant 0 : i32
    %c0_i32_0 = arith.constant 0 : i32
    return %arg0, %arg2, %c0_i32 : i32, i32, i32
  }
  func.func @transform_3(%arg0: i32, %arg1: i32, %arg2: i32) -> (i32, i32, i32) {
    %c0_i32 = arith.constant 0 : i32
    %c0_i32_0 = arith.constant 0 : i32
    return %arg0, %arg1, %c0_i32 : i32, i32, i32
  }
}

</mosaic_0001>

<bundles_post_ra>
// kernel: tpu_custom_call.1
= control target key start
LH: loop header
LB: loop body
LE: loop exit
PB: predicated region body
PF: predicated region fallthrough
CT: control target
= control target key end

     0   :  { %8 = vsyncpa [#allocation7], 0  ;;  %s1250_s0 = inlined_call_operand.vmem [shape: f32[2,32,32], index: 0, kind: input, shape index: {}]   ;;  %s1251_s1 = inlined_call_operand.vmem [shape: f32[2,64,32], index: 1, kind: input, shape index: {}]   ;;  %s1252_s2 = inlined_call_operand.vmem [shape: f32[2,64,32], index: 2, kind: input, shape index: {}]   ;;  %s1253_s3 = inlined_call_operand.hbm [shape: f32[2,32,32], index: 3, kind: output, shape index: {}]  }
   0x1   :  { %10 = vsyncpa [#allocation7 + $0x1], 0  ;;  %s1045_s12 = smov 0   ;;  %s1047_s13 = smov 0  }
   0x2   :  { %s1049_s14 = smov 0   ;;  %s1051_s15 = smov 0  }
   0x3   :  { %s1053_s16 = smov 0   ;;  %s1055_s17 = smov 0  }
   0x4   :  { %s1057_s18 = smov 0   ;;  %s1059_s19 = smov 0  }
   0x5   :  { %s1061_s20 = smov 0   ;;  %s1063_s21 = smov 0  }
   0x6 LB: > { %1261 = sst [smem:[#allocation9_spill]] %s988_s14  ;;  %s713_s22 = sadd.s32 4294967295, %s1016_s21   ;;  %s1016_s21 = sphi %s1063_s21, %s16_s21   ;;  %s1012_s20 = sphi %s1061_s20, %s1279_s20   ;;  %s1008_s19 = sphi %s1059_s19, %s1283_s19   ;;  %s1004_s18 = sphi %s1057_s18, %s1277_s18   ;;  %s1000_s17 = sphi %s1055_s17, %s1276_s17   ;;  %s996_s16 = sphi %s1053_s16, %s1275_s16   ;;  %s992_s15 = sphi %s1051_s15, %s1282_s15   ;;  %s988_s14 = sphi %s1049_s14, %s1273_s14   ;;  %s984_s13 = sphi %s1047_s13, %s1281_s13   ;;  %s980_s12 = sphi %s1045_s12, %s1280_s12  }
   0x7   : > { %1262 = sst [smem:[#allocation10_spill]] %s1004_s18  ;;  %s714_s23 = sadd.s32 4294967294, %s1016_s21  }
   0x8   : > { %1263 = sst [smem:[#allocation11_spill]] %s1008_s19  ;;  %s28_s24 = sadd.s32 1, %s1004_s18 }
   0x9   : > { %1264 = sst [smem:[#allocation12_spill]] %s1012_s20  ;;  %p29_p0 = scmp.ge.s32.totalorder %s28_s24, 2 }
   0xa   : > { %s31_s25 = sadd.s32 1, %s1008_s19  ;;  %s35_s26 = sadd.s32 1, %s1012_s20 }
   0xb   : > { %p138_p1 = scmp.ne.s32.totalorder %s988_s14, %s984_s13  ;;  %s1285_s24 = smov (%p29_p0, %s28_s24), 0 }
   0xc   : > { %1265 = sst [smem:[#allocation13_spill]] %s1285_s24  ;;  %s1287_s25 = smov (!%p29_p0, %s31_s25), %s1008_s19 }
   0xd   : > { %p139_p2 = scmp.eq.s32.totalorder %s713_s22, 7  ;;  %p144_p3 = scmp.ne.s32.totalorder %s984_s13, %s980_s12 }
   0xe   : > { %p33_p4 = scmp.ge.s32.totalorder %s1287_s25, 2  ;;  %p145_p5 = scmp.eq.s32.totalorder %s714_s23, 7 }
   0xf   : > { %p1107_p6 = por %p139_p2, %p138_p1  ;;  %p717_p8 = scmp.ge.s32.totalorder %s1016_s21, 1 }
  0x10   : > { %s1289_s25 = smov (%p33_p4, %s1287_s25), 0  ;;  %s1291_s26 = smov (!%p33_p4, %s35_s26), %s1012_s20 }
  0x11   : > { %1267 = sst [smem:[#allocation14_spill]] %s1289_s25  ;;  %p1114_p7 = por %p145_p5, %p144_p3 }
  0x12   : > { %p37_p9 = scmp.ge.s32.totalorder %s1291_s26, 2  ;;  %p202_p10 = scmp.lt.s32.totalorder %s1016_s21, 9 }
  0x13   : > { %s124_s29 = ssub.s32 %s1008_s19, %s1289_s25  ;;  %s128_s5 = sadd.s32 1, %s988_s14 }
  0x14   : > { %s1293_s26 = smov (%p37_p9, %s1291_s26), 0  ;;  %p203_p11 = pnand %p717_p8, %p202_p10 }
  0x15   : > { %1269 = sst [smem:[#allocation15_spill]] %s1293_s26  ;;  %s123_s30 = ssub.s32 %s1012_s20, %s1293_s26 }
  0x16   : > { %s125_s4 = sor.u32 %s124_s29, %s123_s30  ;;  %206 = sbr.rel (%p203_p11) target bundleno = 889 (0x379), region = 32 }
  0x17   : > { %p126_p12 = scmp.eq.s32.totalorder %s125_s4, 0  ;;  %s1258_s7 = sand.u32 (!%p203_p11), 1, %s984_s13  }
  0x18   : > { %s1132_s8 = sshll.u32 (!%p203_p11), %s996_s16, 1  ;;  %s718_s9 = sshll.u32 (!%p203_p11), %s1258_s7, 4 }
  0x19   : > { %s1128_s6 = scalar_select %p126_p12, %s988_s14, %s128_s5  }
  0x1a   : > { %p249_p13 = scmp.lt.s32.totalorder (!%p203_p11), %s1000_s17, 1  ;;  %p251_p0 = scmp.lt.s32.totalorder (!%p203_p11), %s1132_s8, 3 }
  0x1b   : > { %1270 = sst [smem:[#allocation16_spill]] %s1128_s6  ;;  %s722_s23 = sshll.u32 (!%p203_p11), %s992_s15, 2 }
  0x1c   : > { %p261_p1 = scmp.lt.s32.totalorder (!%p203_p11), %s722_s23, 7  ;;  %p728_p2 = scmp.ne.s32.totalorder (!%p203_p11), %s992_s15, 0 }
  0x1d   : > { %s250_s10 = scalar_select %p249_p13, %s1000_s17, 1 }
  0x1e   : > { %s252_s11 = scalar_select %p251_p0, %s1132_s8, 3 }
  0x1f   : > { %s720_s22 = sshll.u32 %s250_s10, 2  ;;  %s723_s25 = sshll.u32 %s250_s10, 3  ;;  %vm287_vm0 = vcmask (!%p728_p2), 261120   ;;  %vm290_vm1 = vcmask (!%p728_p2), 7168   ;;  %v1018_v4 = vmov (!%p728_p2), -inf   ;;  %v1019_v5 = vmov (!%p728_p2), 0.0  }
  0x20   : > { %s254_s29 = sadd.s32 %s720_s22, %s252_s11  ;;  %s1295_s23 = smov (!%p261_p1, %s722_s23), 7  ;;  %291 = vst.msk [vmem:[#allocation3] sm:$0xff] (!%p728_p2), %vm290_vm1, %v1018_v4  ;;  %292 = vst.msk [vmem:[#allocation3 + $0x8] sm:$0xff] (!%p728_p2), %vm290_vm1, %v1018_v4 }
  0x21   : > { %s721_s30 = sshll.u32 %s254_s29, 3  ;;  %s264_s16 = sadd.s32 %s723_s25, %s1295_s23  ;;  %293 = vst.msk [vmem:[#allocation4] sm:$0xff] (!%p728_p2), %vm290_vm1, %v1019_v5  ;;  %294 = vst.msk [vmem:[#allocation4 + $0x8] sm:$0xff] (!%p728_p2), %vm290_vm1, %v1019_v5 }
  0x22   : > { %s256_s26 = scalar_lea.vmem %s1250_s0, %s721_s30  ;;  %s724_s24 = sshll.u32 %s264_s16, 3  ;;  %295 = vst.msk [vmem:[#allocation5] sm:$0xff] (!%p728_p2), %vm287_vm0, %v1019_v5  ;;  %296 = vst.msk [vmem:[#allocation5 + $0x8] sm:$0xff] (!%p728_p2), %vm287_vm0, %v1019_v5 }
  0x23   : > { %s266_s7 = scalar_lea.vmem %s1251_s1, %s724_s24  ;;  %s1150_s14 = scalar_lea.vmem %s1252_s2, %s724_s24  ;;  %v283_v0 = vld [vmem:[%s256_s26] sm:$0xff] (!%p728_p2)  ;;  %v284_v1 = vld [vmem:[%s256_s26 + $0x8] sm:$0xff] (!%p728_p2) }
  0x24   : > { %s1152_s11 = scalar_lea.vmem [#allocation6], %s718_s9  ;;  %282 = sbr.rel (%p728_p2) target bundleno = 43 (0x2b), region = 36  ;;  %v285_v2 = vmul.f32 (!%p728_p2), 0.17677669, %v283_v0  ;;  %v286_v3 = vmul.f32 (!%p728_p2), 0.17677669, %v284_v1 }
  0x26   : > { %288 = vst.msk [vmem:[#allocation2] sm:$0xff] (!%p728_p2), %vm287_vm0, %v285_v2  ;;  %289 = vst.msk [vmem:[#allocation2 + $0x8] sm:$0xff] (!%p728_p2), %vm287_vm0, %v286_v3 }
  0x2b PF: > { %v299_v6 = vld [vmem:[%s266_s7] sm:$0xff]  ;;  %v300_v7 = vld [vmem:[%s266_s7 + $0x8] sm:$0xff]  ;;  %vm303_vm2 = vcmask 261120   ;;  %v301_v8 = vld [vmem:[%s266_s7 + $0x10] sm:$0xff]  ;;  %v1020_v18 = vmov 0   ;;  %vm441_vm4 = vcmask 7168  }
  0x2c   : > { %v778_v9 = vpack.c.bf16 %v300_v7, %v299_v6  ;;  %vm779_vm3 = vmpackc.low %vm303_vm2, %vm303_vm2  ;;  %v302_v10 = vld [vmem:[%s266_s7 + $0x18] sm:$0xff]  ;;  %891 = vset.pattern.permute.xlu1 %v1020_v18  ;;  %892 = vset.pattern.permute.xlu0 %v1020_v18  ;;  %v397_v19 = vld [vmem:[#allocation3] sm:$0xff]  ;;  %p737_p3 = scmp.ne.s32.totalorder %s992_s15, 1 }
  0x2d   : > { %v297_v11 = vld [vmem:[#allocation2] sm:$0xff]  ;;  %v784_v12 = vpack.c.bf16 %v302_v10, %v301_v8  ;;  %v298_v13 = vld [vmem:[#allocation2 + $0x8] sm:$0xff]  ;;  %v398_v22 = vld [vmem:[#allocation3 + $0x8] sm:$0xff]  ;;  %v1021_v3 = vmov (!%p737_p3), 0  }
  0x2e   : > { %764 = vmatprep.mubr.msk.f32.mxu0 %vm303_vm2, %v297_v11  ;;  %780 = vmatprep.subr.msk.bf16.mxu0 %vm779_vm3, %v778_v9  ;;  %v458_v27 = vld [vmem:[%s1150_s14] sm:$0xff]  ;;  %v459_v28 = vld [vmem:[%s1150_s14 + $0x8] sm:$0xff]  ;;  %v460_v29 = vld [vmem:[%s1150_s14 + $0x10] sm:$0xff] }
  0x2f   : > { %783 = vmatpush3.bf16.xpose.msk.msra.mxu0 %vm779_vm3, %v778_v9  ;;  %v790_v30 = vpack.c.bf16 %v459_v28, %v458_v27  ;;  %v461_v31 = vld [vmem:[%s1150_s14 + $0x18] sm:$0xff]  ;;  %v429_v47 = vld [vmem:[#allocation4] sm:$0xff]  ;;  %v430_v50 = vld [vmem:[#allocation4 + $0x8] sm:$0xff] }
  0x30   : > { %786 = vmatprep.subr.msk.bf16.mxu0 %vm779_vm3, %v784_v12  ;;  %v794_v32 = vpack.c.bf16 %v461_v31, %v460_v29  ;;  %v445_v55 = vld [vmem:[#allocation5 + $0x8] sm:$0xff]  ;;  %v444_v57 = vld [vmem:[#allocation5] sm:$0xff] }
  0x31   : > { %791 = vmatprep.subr.bf16.mxu1 %v790_v30 }
  0x32   : > { %793 = vmatpush3.bf16.msra.mxu1 %v790_v30 }
  0x33   : > { %795 = vmatprep.subr.bf16.mxu1 %v794_v32 }
  0x36   : > { %797 = vmatpush3.bf16.msra.mxu1 %v794_v32 }
  0x37   : > { %789 = vmatpush3.bf16.xpose.msk.msra.mxu0 %vm779_vm3, %v784_v12 }
  0x3e   : > { %765 = vmatmul.mubr.msk.f32.vlgmr.msra.gmra.mrb[0].mxu0 %vm303_vm2, %v298_v13 }
 0x111   : > { %v766_v14 = vpop.f32.mrb[0].mxu0 }
 0x112   : > { %v388_v15 = vpop.f32.mrb[1].mxu0  ;;  %v402_v17 = vsel %vm303_vm2, %v766_v14, -inf }
 0x113   : > { %v399_v16 = vsel %vm303_vm2, %v388_v15, -inf }
 0x114   : > { %400 = vmax.xlane.f32.xlu0 %v399_v16 }
 0x118   : > { %403 = vmax.xlane.f32.xlu0 %v402_v17 }
 0x1a1   : > { %v401_v20 = vpop.xlane.xlu0 %400 }
 0x1a2   : > { %v405_v21 = vmax.f32 %v397_v19, %v401_v20 }
 0x1a4   : > { %v407_v23 = vsub.f32 %v397_v19, %v405_v21  ;;  %547 = vst.msk [vmem:[#allocation3] sm:$0xff] %vm441_vm4, %v405_v21  ;;  %415 = vperm.xlu1 %891, %v405_v21  }
 0x1a5   : > { %v404_v24 = vpop.xlane.xlu0 %403 }
 0x1a6   : > { %v406_v25 = vmax.f32 %v398_v22, %v404_v24  ;;  %v409_v44 = vmul.f32 1.442695, %v407_v23 }
 0x1a8   : > { %v408_v26 = vsub.f32 %v398_v22, %v406_v25  ;;  %548 = vst.msk [vmem:[#allocation3 + $0x8] sm:$0xff] %vm441_vm4, %v406_v25  ;;  %420 = vperm.xlu1 %891, %v406_v25  }
 0x1aa   : > { %v411_v43 = vmul.f32 1.442695, %v408_v26 }
 0x223   : > { %v416_v33 = vpop.permute.xlu1 %415 }
 0x224   : > { %v423_v34 = vsub.f32 %v388_v15, %v416_v33 }
 0x226   : > { %v425_v35 = vmul.f32 1.442695, %v423_v34 }
 0x227   : > { %v421_v36 = vpop.permute.xlu1 %420 }
 0x228   : > { %893 = vpow2.f32 %v425_v35  ;;  %v424_v37 = vsub.f32 %v766_v14, %v421_v36 }
 0x22a   : > { %v427_v38 = vmul.f32 1.442695, %v424_v37 }
 0x22c   : > { %895 = vpow2.f32 %v427_v38 }
 0x22d   : > { %897 = vpow2.f32 %v411_v43 }
 0x22e   : > { %899 = vpow2.f32 %v409_v44 }
 0x232   : > { %v894_v39 = vpop.eup %893 }
 0x233   : > { %775 = vmatprep.mubr.msk.f32.mxu1 %vm303_vm2, %v894_v39  ;;  %v433_v40 = vsel %vm303_vm2, %v894_v39, 0.0 }
 0x234   : > { %434 = vadd.xlane.f32.xlu0 %v433_v40 }
 0x236   : > { %v896_v41 = vpop.eup %895 }
 0x237   : > { %776 = vmatmul.mubr.msk.f32.vlgmr.msra.gmra.mrb[0].mxu1 %vm303_vm2, %v896_v41  ;;  %v436_v42 = vsel %vm303_vm2, %v896_v41, 0.0  ;;  %v898_v45 = vpop.eup %897 }
 0x238   : > { %437 = vadd.xlane.f32.xlu1 %v436_v42  ;;  %v900_v46 = vpop.eup %899  ;;  %v432_v52 = vmul.f32 %v898_v45, %v430_v50 }
 0x239   : > { %v431_v48 = vmul.f32 %v900_v46, %v429_v47 }
 0x249   : > { %453 = vperm.xlu1 %891, %v898_v45  }
 0x24a   : > { %448 = vperm.xlu0 %892, %v900_v46  }
 0x24e   : > { %901 = vset.pattern.permute.xlu0 (!%p737_p3), %v1021_v3 }
 0x2c1   : > { %v435_v49 = vpop.xlane.xlu0 %434 }
 0x2c2   : > { %v439_v51 = vadd.f32 %v435_v49, %v431_v48 }
 0x2c4   : > { %442 = vst.msk [vmem:[#allocation4] sm:$0xff] %vm441_vm4, %v439_v51 }
 0x2c5   : > { %v438_v53 = vpop.xlane.xlu1 %437 }
 0x2c6   : > { %v440_v54 = vadd.f32 %v438_v53, %v432_v52 }
 0x2c8   : > { %443 = vst.msk [vmem:[#allocation4 + $0x8] sm:$0xff] %vm441_vm4, %v440_v54 }
 0x2c9   : > { %v454_v56 = vpop.permute.xlu1 %453  ;;  %v449_v58 = vpop.permute.xlu0 %448 }
 0x2ca   : > { %v457_v59 = vmul.f32 %v454_v56, %v445_v55  ;;  %v456_v60 = vmul.f32 %v449_v58, %v444_v57 }
 0x2cb   : > { %v553_v1 = vld [vmem:[#allocation4] sm:$0xff] (!%p737_p3) }
 0x2cc   : > { %902 = vrcp.f32 (!%p737_p3), %v553_v1 }
 0x2cf   : > { %v554_v2 = vld [vmem:[#allocation4 + $0x8] sm:$0xff] (!%p737_p3) }
 0x2d0   : > { %904 = vrcp.f32 (!%p737_p3), %v554_v2 }
 0x2d6   : > { %v903_v4 = vpop.eup (!%p737_p3), %902 }
 0x2d7   : > { %561 = vperm.xlu0 (!%p737_p3), %901, %v903_v4  }
 0x2da   : > { %v905_v5 = vpop.eup (!%p737_p3), %904 }
 0x2db   : > { %566 = vperm.xlu0 (!%p737_p3), %901, %v905_v5  }
 0x308   : > { %552 = sbr.rel (%p737_p3) target bundleno = 862 (0x35e), region = 40 }
 0x30a   : > { %v777_v61 = vpop.f32.mrb[0].mxu1 }
 0x30b   : > { %v544_v62 = vadd.f32 %v777_v61, %v457_v59  ;;  %v534_v63 = vpop.f32.mrb[1].mxu1 }
 0x30c   : > { %v543_v0 = vadd.f32 %v534_v63, %v456_v60 }
 0x30d   : > { %546 = vst.msk [vmem:[#allocation5 + $0x8] sm:$0xff] %vm303_vm2, %v544_v62 }
 0x30e   : > { %545 = vst.msk [vmem:[#allocation5] sm:$0xff] %vm303_vm2, %v543_v0 }
 0x314   : > { %v558_v9 = vld [vmem:[#allocation5 + $0x8] sm:$0xff] }
 0x315   : > { %v557_v6 = vld [vmem:[#allocation5] sm:$0xff] }
 0x356   : > { %v562_v7 = vpop.permute.xlu0 %561 }
 0x357   : > { %v569_v8 = vmul.f32 %v562_v7, %v557_v6 }
 0x359   : > { %571 = vst.msk [vmem:[%s1152_s11] sm:$0xff] %vm303_vm2, %v569_v8 }
 0x35a   : > { %v567_v10 = vpop.permute.xlu0 %566 }
 0x35b   : > { %v570_v11 = vmul.f32 %v567_v10, %v558_v9 }
 0x35d   : > { %572 = vst.msk [vmem:[%s1152_s11 + $0x8] sm:$0xff] %vm303_vm2, %v570_v11 }
 0x35e PF: > { %s740_s14 = sshll.u32 %s1000_s17, 2  ;;  %s589_s18 = sshll.u32 %s1152_s11, 4  ;;  %s1183_s18 = int_to_ptr.vmem [resolvable:$true] %s589_s18 }
 0x35f   : > { %s586_s15 = sadd.s32 %s740_s14, %s1132_s8  ;;  %s1271_s26 = sand.u32 1, %s984_s13  }
 0x360   : > { %s741_s19 = sshll.u32 %s586_s15, 7  ;;  %s1192_s6 = scalar_lea.sflag [#allocation7], %s1271_s26 }
 0x361   : > { %s1188_s25 = scalar_lea.hbm %s1253_s3, %s741_s19  ;;  %s906_s7 = scalar_lea.vmem %s1183_s18, 256 }
 0x362   : > { %p907_p4 = scmp.ne.s32.totalorder %s1183_s18, %s906_s7  ;;  %s1022_s17 = smov [#allocation6]  }
 0x363   : > { %s910_s8 = sshll.u32 %s1022_s17, 4  ;;  %s911_s8 = int_to_ptr.vmem [resolvable:$false] %s910_s8 }
 0x364   : > { %p908_p5 = pnand %p907_p4, %p1107_p6  ;;  %s912_s9 = scalar_lea.vmem %s911_s8, 512 }
 0x365   : > { %p913_p9 = scmp.lt.s32.totalorder %s1183_s18, %s911_s8  ;;  %p914_p10 = scmp.lt.s32.totalorder %s912_s9, %s906_s7 }
 0x366   : > { %p909_p8 = pneg %p908_p5 }
 0x367   : > { %p915_p11 = por %p914_p10, %p913_p9 }
 0x369   : > { %p916_p12 = pnand %p915_p11, %p909_p8 }
 0x36b   : > { %919 = shalt.err (!%p916_p12)
}
 0x36c   : > { %s920_s10 = scalar_lea.hbm %s1188_s25, 256  ;;  %s924_s29 = scalar_lea.hbm %s1253_s3, 1024 }
 0x36d   : > { %p921_p13 = scmp.ne.s32.totalorder %s1188_s25, %s920_s10  ;;  %p925_p2 = scmp.lt.u32.totalorder %s1188_s25, %s1253_s3 }
 0x36e   : > { %p926_p3 = scmp.lt.u32.totalorder %s924_s29, %s920_s10  ;;  %p928_p5 = scmp.lt.u32.totalorder %s920_s10, %s1188_s25 }
 0x36f   : > { %p922_p0 = pnand %p921_p13, %p1107_p6 }
 0x370   : > { %p927_p4 = por %p926_p3, %p925_p2 }
 0x371   : > { %p923_p1 = pneg %p922_p0 }
 0x372   : > { %p929_p8 = por %p928_p5, %p927_p4 }
 0x374   : > { %p930_p9 = pnand %p929_p8, %p923_p1 }
 0x376   : > { %933 = shalt.err (!%p930_p9)
}
 0x377   : > { %s1023_s5 = smov 128   ;;  %s1024_s16 = smov 8  }
 0x378   : > { %798 = dma.vmem_to_hbm [thread:$0]  (%p1107_p6), %s1183_s18, 256, %s1188_s25, %s1192_s6, %s1023_s5, %s1023_s5, %s1024_s16  }
 0x379 PF: > { %p804_p10 = scmp.ge.s32.totalorder %s1016_s21, 2  ;;  %s604_s11 = sand.u32 1, %s980_s12  }
 0x37a   : > { %s605_s14 = scalar_lea.sflag [#allocation7], %s604_s11 }
 0x37b   : > { %p801_p11 = pnand %p804_p10, %p1114_p7 }
 0x37d   : > { %975 = dma.done.wait (!%p801_p11), %s605_s14, 256  }
 0x37e   : > { %977 = vsyncadd (!%p801_p11), %s605_s14, 4294967040  ;;  %s16_s21 = sadd.s32 1, %s1016_s21   ;;  %s1272_s15 = sld [smem:[#allocation9_spill]] }
 0x37f   : > { %p13_p12 = scmp.ge.s32.totalorder %s16_s21, 10   ;;  %s1273_s14 = sld [smem:[#allocation16_spill]] }
 0x380   : > { %s1274_s19 = sld [smem:[#allocation10_spill]]  ;;  %s1275_s16 = sld [smem:[#allocation11_spill]] }
 0x381   : > { %s1276_s17 = sld [smem:[#allocation12_spill]]  ;;  %s1277_s18 = sld [smem:[#allocation13_spill]] }
 0x382   : > { %s1278_s27 = sld [smem:[#allocation14_spill]]  ;;  %s1279_s20 = sld [smem:[#allocation15_spill]] }
 0x383   : > { %s1280_s12 = smov %s984_s13  ;;  %15 = sbr.rel (!%p13_p12) target bundleno = 6 (0x6), region = 81 }
 0x384   : > { %s1281_s13 = smov %s1272_s15 }
 0x386   : > { %s1282_s15 = smov %s1274_s19 }
 0x388   : > { %s1283_s19 = smov %s1278_s27 }
 0x38a   :  { %610 = vsyncpa [#allocation7], 1 }
 0x38b   :  { %612 = vsyncpa [#allocation7 + $0x1], 1 }

</bundles_post_ra>
